<compile_context>
chip_gen: v7x
topology: tpu7x:2x2x1
jax: 0.10.0
libtpu: 0.0.40
codegen_flags: <defaults>
</compile_context>

<pallas_src>
import functools
import math

import jax
import jax.numpy as jnp
from jax import lax
from jax.experimental import pallas as pl
from jax.experimental.pallas import tpu as pltpu


def _label_smoothing_kernel(x_ref, tgt_ref, dist_ref, rowloss_ref, *,
                            padding_idx, confidence, base,
                            conf_logconf, base_logbase, tile_v, v_total):
    # x_ref:       (TN, TV) log-probs tile (any float dtype)
    # tgt_ref:     (TN, 1)  int32 targets for this row tile
    # dist_ref:    (TN, TV) smoothed target distribution tile (x dtype)
    # rowloss_ref: (TN, 1)  f32 per-row loss, resident/accumulated across the V grid axis
    j = pl.program_id(1)
    col_off = j * tile_v                                              # scalar int32
    n_valid = jnp.minimum(jnp.int32(v_total) - col_off, jnp.int32(tile_v))  # valid cols this tile

    x = x_ref[...].astype(jnp.float32)
    tgt = tgt_ref[...]                                                # (TN, 1) int32
    tn, tv = x.shape

    # Local column ids; global offsets folded into the (TN,1)/scalar comparands instead
    # of a block-wide add.
    col_local = lax.broadcasted_iota(jnp.int32, (tn, tv), 1)
    tgt_local = tgt - col_off                                         # (TN, 1)
    pad_local = jnp.int32(padding_idx) - col_off                      # scalar

    is_tgt = col_local == tgt_local                                   # scatter_(1, target, conf)
    is_pad_row = tgt == jnp.int32(padding_idx)                        # (TN, 1)
    # Combined zero mask: padding column, padding row, or ragged-tail column (col >= V).
    zero = (col_local == pad_local) | (col_local >= n_valid) | is_pad_row

    # true_dist takes only two nonzero values -> build with selects, no runtime log.
    y = jnp.where(is_tgt, jnp.float32(confidence), jnp.float32(base))
    y = jnp.where(zero, jnp.float32(0.0), y)
    dist_ref[...] = y.astype(dist_ref.dtype)

    # -sum_cols(y * x): mask x where y == 0 so ragged-tail garbage / NaNs cannot leak
    # into valid rows (0 * NaN would be NaN).
    x_m = jnp.where(zero, jnp.float32(0.0), x)
    yx_row = jnp.sum(y * x_m, axis=-1, keepdims=True)                 # (TN, 1)

    # sum_cols(y * log y) hoisted to per-row scalar math:
    #   non-padding rows: (#base columns) * base*log(base) + [target in tile] * conf*log(conf)
    tgt_in_tile = ((tgt_local >= 0) & (tgt_local < n_valid)).astype(jnp.float32)   # (TN, 1)
    pad_in_tile = ((pad_local >= 0) & (pad_local < n_valid)).astype(jnp.float32)   # scalar
    n_base = n_valid.astype(jnp.float32) - pad_in_tile - tgt_in_tile                # (TN, 1)
    ylogy_row = n_base * jnp.float32(base_logbase) + tgt_in_tile * jnp.float32(conf_logconf)
    ylogy_row = jnp.where(is_pad_row, jnp.float32(0.0), ylogy_row)

    @pl.when(j == 0)
    def _():
        rowloss_ref[...] = jnp.zeros_like(rowloss_ref)

    # KL term per row: sum(y*log y) - sum(y*x); both pieces are 0 where y == 0.
    rowloss_ref[...] += ylogy_row - yx_row


def _round_up(a, b):
    return ((a + b - 1) // b) * b


def _choose_tiles(n, v):
    # Column tile: full dim for small vocabs (always a legal block shape), otherwise a
    # lane-aligned 1024-wide tile; the ragged tail is masked in-kernel.  1 MiB f32 per
    # x tile keeps double-buffered x+dist plus temporaries far below v7x's 64 MiB VMEM.
    tile_v = v if v <= 1024 else 1024
    # Row tile: multiple of 8, capped at 256, and at most ~half the rows so the
    # "parallel" row axis has >= 2 tiles to shard across v7x's two TensorCores.
    if n <= 8:
        tile_n = n
    else:
        tile_n = min(256, _round_up((n + 1) // 2, 8))
    return tile_n, tile_v


def label_smoothing(x, target, *, padding_idx, smoothing, tile_n=None, tile_v=None):
    """x: (N, V) log-probs; target: (N,) int.

    Returns (loss scalar f32, true_dist (N, V) in x.dtype)."""
    n, v = x.shape
    size = v

    confidence = 1.0 - smoothing
    base = smoothing / (size - 2)
    # Compile-time constants; 0*log(0) := 0 handles smoothing == 0 or == 1.
    conf_logconf = confidence * math.log(confidence) if confidence > 0.0 else 0.0
    base_logbase = base * math.log(base) if base > 0.0 else 0.0

    auto_tn, auto_tv = _choose_tiles(n, v)
    tile_n = auto_tn if tile_n is None else int(tile_n)
    tile_v = auto_tv if tile_v is None else int(tile_v)
    grid = (pl.cdiv(n, tile_n), pl.cdiv(v, tile_v))

    tgt2d = target.astype(jnp.int32).reshape(n, 1)

    kernel = functools.partial(
        _label_smoothing_kernel,
        padding_idx=int(padding_idx),
        confidence=float(confidence), base=float(base),
        conf_logconf=float(conf_logconf), base_logbase=float(base_logbase),
        tile_v=int(tile_v), v_total=int(v),
    )

    # Scoped-VMEM budget: double-buffered x + dist tiles, a few block-sized f32/i32
    # temporaries, and margin.  Clamped to [32 MiB, 64 MiB] (safe on v5e / v6e / v7x).
    x_bytes = jnp.dtype(x.dtype).itemsize
    tile_elems = tile_n * tile_v
    vmem_limit = 2 * tile_elems * 2 * x_bytes + 6 * tile_elems * 4 + (4 << 20)
    vmem_limit = int(min(max(vmem_limit, 32 << 20), 64 << 20))

    cost = pl.CostEstimate(
        flops=10 * n * v,
        transcendentals=0,
        bytes_accessed=n * v * 2 * x_bytes + n * 8,
    )

    dist, rowloss = pl.pallas_call(
        kernel,
        out_shape=(
            jax.ShapeDtypeStruct((n, v), x.dtype),      # true_dist in x's dtype (matches clone())
            jax.ShapeDtypeStruct((n, 1), jnp.float32),  # per-row partial losses
        ),
        grid=grid,
        in_specs=[
            pl.BlockSpec((tile_n, tile_v), lambda i, j: (i, j)),   # x
            pl.BlockSpec((tile_n, 1), lambda i, j: (i, 0)),        # target
        ],
        out_specs=(
            pl.BlockSpec((tile_n, tile_v), lambda i, j: (i, j)),   # true_dist
            pl.BlockSpec((tile_n, 1), lambda i, j: (i, 0)),        # row loss (resident over j)
        ),
        compiler_params=pltpu.CompilerParams(
            dimension_semantics=("parallel", "arbitrary"),
            vmem_limit_bytes=vmem_limit,
        ),
        cost_estimate=cost,
    )(x, tgt2d)

    loss = jnp.sum(rowloss)
    return loss, dist


def _reference(x, target, *, padding_idx, smoothing):
    n, v = x.shape
    confidence = 1.0 - smoothing
    base = smoothing / (v - 2)
    true_dist = jnp.full((n, v), base, jnp.float32)
    true_dist = true_dist.at[jnp.arange(n), target].set(confidence)
    true_dist = true_dist.at[:, padding_idx].set(0.0)
    true_dist = jnp.where((target == padding_idx)[:, None], 0.0, true_dist)
    pos = true_dist > 0
    safe = jnp.where(pos, true_dist, 1.0)
    loss = jnp.sum(jnp.where(pos, true_dist * (jnp.log(safe) - x.astype(jnp.float32)), 0.0))
    return loss, true_dist


if __name__ == "__main__":
    key = jax.random.PRNGKey(0)
    kx, kt, kx2, kt2 = jax.random.split(key, 4)

    # --- Test 1: batch=2, seq=8 -> N=16 flattened tokens; vocab V=32 (divisible case). ---
    N, V = 16, 32
    padding_idx = 0
    smoothing = 0.1
    logits = jax.random.normal(kx, (N, V), jnp.float32)
    x = jax.nn.log_softmax(logits, axis=-1)          # KLDivLoss expects log-probabilities
    target = jax.random.randint(kt, (N,), 0, V, jnp.int32)
    target = target.at[3].set(padding_idx)           # exercise the padding-row mask

    loss, true_dist = label_smoothing(x, target, padding_idx=padding_idx, smoothing=smoothing)
    jax.block_until_ready((loss, true_dist))

    ref_loss, ref_dist = _reference(x, target, padding_idx=padding_idx, smoothing=smoothing)
    assert jnp.allclose(loss, ref_loss, rtol=1e-5, atol=1e-5), (loss, ref_loss)
    assert jnp.allclose(true_dist.astype(jnp.float32), ref_dist, rtol=1e-6, atol=1e-6)

    # --- Test 2: ragged tiles (N=12 rows, tile_n=8; V=160 cols, tile_v=128) to exercise
    #     the cdiv grid + in-kernel tail masking path used for realistic vocab sizes. ---
    N2, V2 = 12, 160
    padding_idx2 = 2
    smoothing2 = 0.2
    logits2 = jax.random.normal(kx2, (N2, V2), jnp.float32)
    x2 = jax.nn.log_softmax(logits2, axis=-1)
    target2 = jax.random.randint(kt2, (N2,), 0, V2, jnp.int32)
    target2 = target2.at[5].set(padding_idx2)        # padding row
    target2 = target2.at[7].set(V2 - 1)              # target lives in the ragged last col tile

    loss2, dist2 = label_smoothing(x2, target2, padding_idx=padding_idx2,
                                   smoothing=smoothing2, tile_n=8, tile_v=128)
    jax.block_until_ready((loss2, dist2))

    ref_loss2, ref_dist2 = _reference(x2, target2, padding_idx=padding_idx2, smoothing=smoothing2)
    assert jnp.allclose(loss2, ref_loss2, rtol=1e-5, atol=1e-5), (loss2, ref_loss2)
    assert jnp.allclose(dist2.astype(jnp.float32), ref_dist2, rtol=1e-6, atol=1e-6)

    print("KERNEL_OK")
</pallas_src>

<mosaic_0001>
module attributes {stable_mosaic.version = 11 : i64} {
  func.func @_label_smoothing_kernel(%arg0: i32, %arg1: i32, %arg2: memref<8x32xf32, #tpu.memory_space<vmem>>, %arg3: memref<8x1xi32, #tpu.memory_space<vmem>>, %arg4: memref<8x32xf32, #tpu.memory_space<vmem>>, %arg5: memref<8x1xf32, #tpu.memory_space<vmem>>) attributes {dimension_semantics = [#tpu.dimension_semantics<parallel>, #tpu.dimension_semantics<arbitrary>], iteration_bounds = array<i64: 2, 1>, scalar_prefetch = 0 : i64, scratch_operands = 0 : i64, tpu.core_type = #tpu.core_type<tc>, window_params = [{transform_indices = @transform_0, window_bounds = array<i64: 8, 32>}, {transform_indices = @transform_1, window_bounds = array<i64: 8, 1>}, {transform_indices = @transform_2, window_bounds = array<i64: 8, 32>}, {transform_indices = @transform_3, window_bounds = array<i64: 8, 1>}]} {
    %c32_i32 = arith.constant 32 : i32
    %0 = arith.muli %arg1, %c32_i32 : i32
    %c32_i32_0 = arith.constant 32 : i32
    %1 = arith.subi %c32_i32_0, %0 : i32
    %c32_i32_1 = arith.constant 32 : i32
    %2 = arith.minsi %1, %c32_i32_1 : i32
    %c0 = arith.constant 0 : index
    %c0_2 = arith.constant 0 : index
    %3 = vector.load %arg2[%c0, %c0_2] : memref<8x32xf32, #tpu.memory_space<vmem>>, vector<8x32xf32>
    %c0_3 = arith.constant 0 : index
    %c0_4 = arith.constant 0 : index
    %4 = vector.load %arg3[%c0_3, %c0_4] : memref<8x1xi32, #tpu.memory_space<vmem>>, vector<8x1xi32>
    %5 = tpu.iota {dimensions = array<i32: 1>} : vector<8x32xi32>
    %6 = vector.broadcast %0 : i32 to vector<8x1xi32>
    %7 = arith.subi %4, %6 : vector<8x1xi32>
    %c0_i32 = arith.constant 0 : i32
    %8 = arith.subi %c0_i32, %0 : i32
    %9 = vector.broadcast %7 : vector<8x1xi32> to vector<8x32xi32>
    %10 = arith.cmpi eq, %5, %9 : vector<8x32xi32>
    %c0_i32_5 = arith.constant 0 : i32
    %11 = vector.broadcast %c0_i32_5 : i32 to vector<8x1xi32>
    %12 = arith.cmpi eq, %4, %11 : vector<8x1xi32>
    %13 = vector.broadcast %8 : i32 to vector<8x32xi32>
    %14 = arith.cmpi eq, %5, %13 : vector<8x32xi32>
    %15 = vector.broadcast %2 : i32 to vector<8x32xi32>
    %16 = arith.cmpi sge, %5, %15 : vector<8x32xi32>
    %17 = arith.ori %14, %16 : vector<8x32xi1>
    %18 = vector.broadcast %12 : vector<8x1xi1> to vector<8x32xi1>
    %19 = arith.ori %17, %18 : vector<8x32xi1>
    %cst = arith.constant 0.899999976 : f32
    %cst_6 = arith.constant 0.00333333341 : f32
    %20 = vector.broadcast %cst : f32 to vector<8x32xf32>
    %21 = vector.broadcast %cst_6 : f32 to vector<8x32xf32>
    %22 = arith.select %10, %20, %21 : vector<8x32xi1>, vector<8x32xf32>
    %cst_7 = arith.constant 0.000000e+00 : f32
    %23 = vector.broadcast %cst_7 : f32 to vector<8x32xf32>
    %24 = arith.select %19, %23, %22 : vector<8x32xi1>, vector<8x32xf32>
    %c0_8 = arith.constant 0 : index
    %c0_9 = arith.constant 0 : index
    %25 = vector.load %arg4[%c0_8, %c0_9] : memref<8x32xf32, #tpu.memory_space<vmem>>, vector<8x32xf32>
    tpu.vector_store %arg4[%c0_8, %c0_9], %24 {strides = array<i32>} : memref<8x32xf32, #tpu.memory_space<vmem>>, vector<8x32xf32>,
    %cst_10 = arith.constant 0.000000e+00 : f32
    %26 = vector.broadcast %cst_10 : f32 to vector<8x32xf32>
    %27 = arith.select %19, %26, %3 : vector<8x32xi1>, vector<8x32xf32>
    %28 = arith.mulf %24, %27 : vector<8x32xf32>
    %cst_11 = arith.constant dense<0.000000e+00> : vector<8xf32>
    %29 = vector.multi_reduction <add>, %28, %cst_11 [1] : vector<8x32xf32> to vector<8xf32>
    %30 = vector.shape_cast %29 : vector<8xf32> to vector<8x1xf32>
    %c0_i32_12 = arith.constant 0 : i32
    %31 = vector.broadcast %c0_i32_12 : i32 to vector<8x1xi32>
    %32 = arith.cmpi sge, %7, %31 : vector<8x1xi32>
    %33 = vector.broadcast %2 : i32 to vector<8x1xi32>
    %34 = arith.cmpi slt, %7, %33 : vector<8x1xi32>
    %35 = arith.andi %32, %34 : vector<8x1xi1>
    %36 = arith.extui %35 : vector<8x1xi1> to vector<8x1xi32>
    %37 = arith.sitofp %36 : vector<8x1xi32> to vector<8x1xf32>
    %c0_i32_13 = arith.constant 0 : i32
    %38 = arith.cmpi sge, %8, %c0_i32_13 : i32
    %39 = arith.cmpi slt, %8, %2 : i32
    %40 = arith.andi %38, %39 : i1
    %41 = arith.extui %40 : i1 to i32
    %42 = arith.sitofp %41 : i32 to f32
    %43 = arith.sitofp %2 : i32 to f32
    %44 = arith.subf %43, %42 : f32
    %45 = vector.broadcast %44 : f32 to vector<8x1xf32>
    %46 = arith.subf %45, %37 : vector<8x1xf32>
    %cst_14 = arith.constant -0.0190126076 : f32
    %47 = vector.broadcast %cst_14 : f32 to vector<8x1xf32>
    %48 = arith.mulf %46, %47 : vector<8x1xf32>
    %cst_15 = arith.constant -0.0948244631 : f32
    %49 = vector.broadcast %cst_15 : f32 to vector<8x1xf32>
    %50 = arith.mulf %37, %49 : vector<8x1xf32>
    %51 = arith.addf %48, %50 : vector<8x1xf32>
    %cst_16 = arith.constant 0.000000e+00 : f32
    %52 = vector.broadcast %cst_16 : f32 to vector<8x1xf32>
    %53 = arith.select %12, %52, %51 : vector<8x1xi1>, vector<8x1xf32>
    %c0_i32_17 = arith.constant 0 : i32
    %54 = arith.cmpi eq, %arg1, %c0_i32_17 : i32
    %55 = arith.extui %54 : i1 to i32
    %c0_i32_18 = arith.constant 0 : i32
    %56 = arith.cmpi ne, %55, %c0_i32_18 : i32
    scf.if %56 {
      %cst_23 = arith.constant 0.000000e+00 : f32
      %61 = vector.broadcast %cst_23 : f32 to vector<8x1xf32>
      %c0_24 = arith.constant 0 : index
      %c0_25 = arith.constant 0 : index
      %62 = vector.load %arg5[%c0_24, %c0_25] : memref<8x1xf32, #tpu.memory_space<vmem>>, vector<8x1xf32>
      tpu.vector_store %arg5[%c0_24, %c0_25], %61 {strides = array<i32>} : memref<8x1xf32, #tpu.memory_space<vmem>>, vector<8x1xf32>,
    } else {
    }
    %c0_19 = arith.constant 0 : index
    %c0_20 = arith.constant 0 : index
    %57 = vector.load %arg5[%c0_19, %c0_20] : memref<8x1xf32, #tpu.memory_space<vmem>>, vector<8x1xf32>
    %58 = arith.subf %53, %30 : vector<8x1xf32>
    %59 = arith.addf %57, %58 : vector<8x1xf32>
    %c0_21 = arith.constant 0 : index
    %c0_22 = arith.constant 0 : index
    %60 = vector.load %arg5[%c0_21, %c0_22] : memref<8x1xf32, #tpu.memory_space<vmem>>, vector<8x1xf32>
    tpu.vector_store %arg5[%c0_21, %c0_22], %59 {strides = array<i32>} : memref<8x1xf32, #tpu.memory_space<vmem>>, vector<8x1xf32>,
    return
  }
  func.func @transform_0(%arg0: i32, %arg1: i32) -> (i32, i32) {
    %c0_i32 = arith.constant 0 : i32
    return %arg0, %arg1 : i32, i32
  }
  func.func @transform_1(%arg0: i32, %arg1: i32) -> (i32, i32) {
    %c0_i32 = arith.constant 0 : i32
    %c0_i32_0 = arith.constant 0 : i32
    return %arg0, %c0_i32 : i32, i32
  }
  func.func @transform_2(%arg0: i32, %arg1: i32) -> (i32, i32) {
    %c0_i32 = arith.constant 0 : i32
    return %arg0, %arg1 : i32, i32
  }
  func.func @transform_3(%arg0: i32, %arg1: i32) -> (i32, i32) {
    %c0_i32 = arith.constant 0 : i32
    %c0_i32_0 = arith.constant 0 : i32
    return %arg0, %c0_i32 : i32, i32
  }
}

</mosaic_0001>

<bundles_post_ra>
// kernel: tpu_custom_call.1
= control target key start
LH: loop header
LB: loop body
LE: loop exit
PB: predicated region body
PF: predicated region fallthrough
CT: control target
= control target key end

     0   :  { %9 = vsyncpa [#allocation3], 0  ;;  %s717_s0 = inlined_call_operand.vmem [shape: f32[16,32], index: 0, kind: input, shape index: {}]   ;;  %s718_s1 = inlined_call_operand.vmem [shape: s32[16,1], index: 1, kind: input, shape index: {}]   ;;  %s719_s2 = inlined_call_operand.hbm [shape: f32[16,32], index: 2, kind: output, shape index: {0}]   ;;  %s720_s3 = inlined_call_operand.vmem [shape: f32[16,1], index: 3, kind: output, shape index: {1}]  }
   0x1   :  { %11 = vsyncpa [#allocation3 + $0x1], 0  ;;  %s591_s12 = smov 0   ;;  %s593_s13 = smov 0  }
   0x2   :  { %s595_s14 = smov 0   ;;  %s597_s15 = smov 0  }
   0x3   :  { %s599_s16 = smov 0   ;;  %s601_s17 = smov 0  }
   0x4 LB: > { %s414_s18 = sadd.s32 4294967295, %s565_s17   ;;  %s415_s19 = sadd.s32 4294967294, %s565_s17   ;;  %s565_s17 = sphi %s601_s17, %s17_s17   ;;  %s561_s16 = sphi %s599_s16, %s727_s16   ;;  %s557_s15 = sphi %s597_s15, %s726_s15   ;;  %s553_s14 = sphi %s595_s14, %s725_s14   ;;  %s549_s13 = sphi %s593_s13, %s724_s13   ;;  %s545_s12 = sphi %s591_s12, %s723_s12  }
   0x5   : > { %s29_s20 = sadd.s32 1, %s561_s16  ;;  %s92_s21 = sadd.s32 1, %s553_s14 }
   0x6   : > { %p31_p0 = scmp.ge.s32.totalorder %s29_s20, 2  ;;  %p102_p1 = scmp.ne.s32.totalorder %s553_s14, %s549_s13 }
   0x7   : > { %p103_p2 = scmp.eq.s32.totalorder %s414_s18, 1  ;;  %p108_p3 = scmp.ne.s32.totalorder %s549_s13, %s545_s12 }
   0x8   : > { %s729_s20 = smov (%p31_p0, %s29_s20), 0  ;;  %p109_p5 = scmp.eq.s32.totalorder %s415_s19, 1 }
   0x9   : > { %p631_p4 = por %p103_p2, %p102_p1  ;;  %s87_s23 = ssub.s32 %s561_s16, %s729_s20 }
   0xa   : > { %p418_p6 = scmp.ge.s32.totalorder %s565_s17, 1  ;;  %p90_p7 = scmp.eq.s32.totalorder %s87_s23, 0 }
   0xb   : > { %p638_p8 = por %p109_p5, %p108_p3  ;;  %p170_p9 = scmp.lt.s32.totalorder %s565_s17, 3 }
   0xc   : > { %s644_s25 = scalar_select %p90_p7, %s553_s14, %s92_s21  }
   0xd   : > { %p171_p10 = pnand %p418_p6, %p170_p9 }
   0xe   : > { %p204_p11 = scmp.lt.s32.totalorder (!%p171_p10), %s557_s15, 1  ;;  %v567_v0 = vmov (!%p171_p10), 0   ;;  %vm278_vm3 = vcmask (!%p171_p10), 7168   ;;  %v568_v3 = vmov (!%p171_p10), 0.0   ;;  %v225_v10 = vlaneseq (!%p171_p10)  ;;  %s195_s7 = sand.u32 (!%p171_p10), 1, %s549_s13  }
   0xf   : > { %174 = sbr.rel (%p171_p10) target bundleno = 312 (0x138), region = 28  ;;  %486 = vset.pattern.permute.xlu0 (!%p171_p10), %v567_v0  ;;  %s419_s11 = sshll.u32 (!%p171_p10), %s195_s7, 3  ;;  %vm248_vm10 = vcmask (!%p171_p10), 261120   ;;  %v569_v15 = vmov (!%p171_p10), 0.0033333334  }
  0x10   : > { %v226_v11 = vand.u32 (!%p171_p10), 127, %v225_v10  ;;  %s197_s18 = scalar_lea.vmem (!%p171_p10), [#allocation2], %s419_s11  ;;  %s425_s19 = sshll.u32 (!%p171_p10), %s557_s15, 7 }
  0x11   : > { %s304_s21 = sshll.u32 (!%p171_p10), %s197_s18, 4  ;;  %s286_s28 = scalar_lea.sflag (!%p171_p10), [#allocation3], %s195_s7  ;;  %s305_s21 = int_to_ptr.vmem [resolvable:$true] %s304_s21 }
  0x12   : > { %vm236_vm5 = vcmp.eq.s32.totalorder (!%p171_p10), %v226_v11, 0  ;;  %vm238_vm6 = vcmp.ge.s32.totalorder (!%p171_p10), %v226_v11, 32  ;;  %s487_s29 = scalar_lea.vmem (!%p171_p10), %s305_s21, 128 }
  0x13   : > { %vm239_vm8 = vmor (!%p171_p10), %vm236_vm5, %vm238_vm6  ;;  %p488_p12 = scmp.ne.s32.totalorder (!%p171_p10), %s305_s21, %s487_s29 }
  0x15   : > { %p489_p13 = pnand (!%p171_p10), %p488_p12, %p631_p4 }
  0x16   : > { %s205_s26 = scalar_select %p204_p11, %s557_s15, 1 }
  0x17   : > { %p490_p0 = pneg %p489_p13 }
  0x18   : > { %s648_s27 = sshll.u32 %s205_s26, 3 }
  0x19   : > { %s214_s30 = scalar_lea.vmem %s718_s1, %s648_s27  ;;  %s659_s6 = scalar_lea.vmem %s720_s3, %s648_s27 }
  0x1a   : > { %v224_v1 = vld [vmem:[%s214_s30] sm:$0xff]  ;;  %279 = vst.msk [vmem:[%s659_s6] sm:$0xff] %vm278_vm3, %v568_v3  ;;  %s210_s10 = scalar_lea.vmem %s717_s0, %s648_s27  ;;  %s673_s27 = scalar_lea.hbm %s719_s2, %s425_s19 }
  0x1b   : > { %vm234_vm0 = vcmp.eq.s32.totalorder %v224_v1, 0  ;;  %231 = vperm.xlu0 %486, %v224_v1   ;;  %vm255_vm1 = vcmp.ge.s32.totalorder %v224_v1, 0  ;;  %vm256_vm2 = vcmp.lt.s32.totalorder %v224_v1, 32  ;;  %v223_v14 = vld [vmem:[%s210_s10] sm:$0xff]  ;;  %s570_s30 = smov [#allocation2]  }
  0x1c   : > { %v240_v2 = vsel %vm234_vm0, 1, %v567_v0  ;;  %vm257_vm4 = vmand %vm255_vm1, %vm256_vm2  ;;  %s491_s4 = sshll.u32 %s570_s30, 4  ;;  %s492_s4 = int_to_ptr.vmem [resolvable:$false] %s491_s4 }
  0x1d   : > { %v423_v4 = vsel %vm257_vm4, 1.0, %v568_v3  ;;  %s493_s5 = scalar_lea.vmem %s492_s4, 256  ;;  %p494_p1 = scmp.lt.s32.totalorder %s305_s21, %s492_s4 }
  0x1e   : > { %v269_v5 = vsub.f32 31.0, %v423_v4  ;;  %v271_v6 = vmul.f32 -0.09482446, %v423_v4  ;;  %p495_p2 = scmp.lt.s32.totalorder %s493_s5, %s487_s29 }
  0x1f   : > { %242 = vperm.xlu0 %486, %v240_v2  }
  0x20   : > { %v270_v7 = vmul.f32 -0.019012608, %v269_v5  ;;  %p496_p3 = por %p495_p2, %p494_p1 }
  0x22   : > { %v272_v8 = vadd.f32 %v271_v6, %v270_v7  ;;  %p497_p5 = pnand %p496_p3, %p490_p0 }
  0x24   : > { %v273_v9 = vsel %vm234_vm0, 0.0, %v272_v8 }
  0x9a   : > { %v232_v12 = vpop.permute.xlu0 %231 }
  0x9b   : > { %vm233_vm7 = vcmp.eq.s32.totalorder %v226_v11, %v232_v12 }
  0x9c   : > { %v246_v16 = vsel %vm233_vm7, 0.9, %v569_v15 }
  0x9e   : > { %v243_v13 = vpop.permute.xlu0 %242 }
  0x9f   : > { %vm244_vm9 = vcmp.eq.s32.totalorder %v243_v13, 1 }
  0xa0   : > { %vm245_vm11 = vmor %vm239_vm8, %vm244_vm9 }
  0xa1   : > { %v247_v17 = vsel %vm245_vm11, 0.0, %v246_v16  ;;  %v250_v18 = vsel %vm245_vm11, 0.0, %v223_v14 }
  0xa2   : > { %v251_v19 = vmul.f32 %v250_v18, %v247_v17  ;;  %249 = vst.msk [vmem:[%s197_s18] sm:$0xff] %vm248_vm10, %v247_v17 }
  0xa4   : > { %v252_v20 = vsel %vm248_vm10, %v251_v19, 0.0 }
  0xa5   : > { %253 = vadd.xlane.f32.xlu1 %v252_v20 }
  0xa6   : > { %500 = shalt.err (!%p497_p5)
}
  0xa7   : > { %s501_s15 = scalar_lea.hbm %s673_s27, 128  ;;  %s505_s9 = scalar_lea.hbm %s719_s2, 256 }
  0xa8   : > { %p502_p6 = scmp.ne.s32.totalorder %s673_s27, %s501_s15  ;;  %p506_p10 = scmp.lt.u32.totalorder %s673_s27, %s719_s2 }
  0xa9   : > { %p507_p11 = scmp.lt.u32.totalorder %s505_s9, %s501_s15  ;;  %p509_p13 = scmp.lt.u32.totalorder %s501_s15, %s673_s27 }
  0xaa   : > { %p503_p7 = pnand %p502_p6, %p631_p4 }
  0xab   : > { %p508_p12 = por %p507_p11, %p506_p10 }
  0xac   : > { %p504_p9 = pneg %p503_p7 }
  0xad   : > { %p510_p0 = por %p509_p13, %p508_p12 }
  0xaf   : > { %p511_p1 = pnand %p510_p0, %p504_p9 }
  0xb1   : > { %514 = shalt.err (!%p511_p1)
}
  0xb2   : > { %428 = dma.vmem_to_hbm [thread:$0]  (%p631_p4), %s305_s21, 128, %s673_s27, %s286_s28   ;;  %v280_v21 = vld [vmem:[%s659_s6] sm:$0xff] }
 0x132   : > { %v254_v22 = vpop.xlane.xlu1 %253 }
 0x133   : > { %v281_v23 = vsub.f32 %v273_v9, %v254_v22 }
 0x135   : > { %v282_v24 = vadd.f32 %v281_v23, %v280_v21 }
 0x137   : > { %284 = vst.msk [vmem:[%s659_s6] sm:$0xff] %vm278_vm3, %v282_v24 }
 0x138 PF: > { %p434_p2 = scmp.ge.s32.totalorder %s565_s17, 2  ;;  %s319_s18 = sand.u32 1, %s545_s12  }
 0x139   : > { %s320_s19 = scalar_lea.sflag [#allocation3], %s319_s18 }
 0x13a   : > { %p431_p3 = pnand %p434_p2, %p638_p8 }
 0x13c   : > { %540 = dma.done.wait (!%p431_p3), %s320_s19, 128  }
 0x13d   : > { %542 = vsyncadd (!%p431_p3), %s320_s19, 4294967168  ;;  %s17_s17 = sadd.s32 1, %s565_s17   ;;  %s723_s12 = smov %s549_s13 }
 0x13e   : > { %p14_p4 = scmp.ge.s32.totalorder %s17_s17, 4   ;;  %s724_s13 = smov %s553_s14 }
 0x13f   : > { %s725_s14 = smov %s644_s25  ;;  %s726_s15 = smov %s561_s16 }
 0x140   : > { %s727_s16 = smov %s729_s20  ;;  %16 = sbr.rel (!%p14_p4) target bundleno = 4 (0x4), region = 82 }
 0x147   :  { %332 = vsyncpa [#allocation3], 1 }
 0x148   :  { %334 = vsyncpa [#allocation3 + $0x1], 1 }

</bundles_post_ra>
